<compile_context>
chip_gen: v7x
topology: tpu7x:2x2x1
jax: 0.10.0
libtpu: 0.0.40
codegen_flags: <defaults>
</compile_context>

<pallas_src>
import functools

import jax
import jax.numpy as jnp
import numpy as np
from jax.experimental import pallas as pl
from jax.experimental.pallas import tpu as pltpu


def _round_up(x, m):
    return (x + m - 1) // m * m


def _seq_vmem_estimate(tc, bb, hp):
    g = 4 * hp
    return (2 * tc * bb * g * 2          # gx blocks (bf16, double-buffered)
            + 2 * tc * bb * hp * 4       # out blocks (f32, double-buffered)
            + 8 * bb * hp * 4            # h0/c0/hN/cN pipeline blocks
            + hp * g * 2                 # resident W_hh^T scratch (bf16, single copy)
            + 2 * bb * hp * 4)           # h/c carry scratch


# ---------------------------------------------------------------------------
# Sequence kernel: one (tc timesteps, bb batch rows) chunk per grid step.
# Input projection (x @ W_ih^T + bias) is already folded into gx (bf16).
# ---------------------------------------------------------------------------
def _lstm_seq_kernel(gx_ref, w_hh_hbm, h0_ref, c0_ref,
                     out_ref, hN_ref, cN_ref,
                     w_scr, h_scr, c_scr, dma_sem,
                     *, hp, tc, t_valid, padded):
    """gx_ref : (tc, bb, 4*hp) bf16   gate pre-activations, gate slabs lane-aligned to hp
       w_hh_hbm: (hp, 4*hp)    bf16   padded W_hh^T, raw HBM ref (memory_space=ANY)
       h0/c0  : (bb, hp)       f32    initial state for this batch block
       out_ref: (tc, bb, hp)          hidden outputs for this chunk
       hN/cN  : (bb, hp)       f32    final state (written only on the last chunk)
       w_scr  : (hp, 4*hp)     bf16   VMEM-resident weight (copied once per batch block)
       h_scr/c_scr : (bb, hp)  f32    state carried across time chunks in VMEM scratch
    """
    t_chunk = pl.program_id(1)

    @pl.when(t_chunk == 0)
    def _():
        # Copy W_hh^T HBM -> VMEM once; it stays resident (single-buffered) thereafter.
        cp = pltpu.make_async_copy(w_hh_hbm, w_scr, dma_sem.at[0])
        cp.start()
        h_scr[...] = h0_ref[...]
        c_scr[...] = c0_ref[...]
        cp.wait()

    def step(t, carry):
        h, c = carry
        gates = gx_ref[t].astype(jnp.float32) + jnp.dot(
            h.astype(jnp.bfloat16), w_scr[...],
            preferred_element_type=jnp.float32)
        i_g = jax.nn.sigmoid(gates[:, 0 * hp:1 * hp])
        f_g = jax.nn.sigmoid(gates[:, 1 * hp:2 * hp])
        g_g = jnp.tanh(gates[:, 2 * hp:3 * hp])
        o_g = jax.nn.sigmoid(gates[:, 3 * hp:4 * hp])
        c_new = f_g * c + i_g * g_g
        h_new = o_g * jnp.tanh(c_new)
        if padded:  # static: only emitted when T was zero-padded up to a multiple of tc
            ok = (t_chunk * tc + t) < t_valid
            h_new = jnp.where(ok, h_new, h)
            c_new = jnp.where(ok, c_new, c)
        out_ref[t] = h_new.astype(out_ref.dtype)
        return h_new, c_new

    if tc <= 8:
        unroll = True          # short chunks: fully unroll for LLO scheduling visibility
    elif tc % 2 == 0:
        unroll = 2             # long chunks: cap live ranges to avoid vreg spills
    else:
        unroll = 1
    h, c = jax.lax.fori_loop(0, tc, step, (h_scr[...], c_scr[...]), unroll=unroll)
    h_scr[...] = h
    c_scr[...] = c

    @pl.when(t_chunk == pl.num_programs(1) - 1)
    def _():
        hN_ref[...] = h
        cN_ref[...] = c


@functools.partial(jax.jit, static_argnames=("h_real", "time_block", "batch_block",
                                              "vmem_budget_bytes"))
def lstm_sequence(x_bte, w_ih_pad, w_hh_pad, bias_pad, h0_pad, c0_pad, *,
                  h_real, time_block=32, batch_block=None,
                  vmem_budget_bytes=32 * 1024 * 1024):
    """Run the LSTM over (B, T, E). Returns (out (B,T,h_real), h_n (B,Hp), c_n (B,Hp))."""
    B, T, E = x_bte.shape
    Hp = h0_pad.shape[-1]
    G = 4 * Hp

    # Batch block: must divide B and be a multiple of 8 (or equal B) for (8,128) tiling.
    bb = B if batch_block is None else batch_block
    if bb <= 0 or B % bb or (bb != B and bb % 8):
        bb = B
    nb = B // bb

    # Time block: clamp so the per-step VMEM footprint stays inside the budget.
    tc = max(1, min(time_block, T))
    while tc > 8 and _seq_vmem_estimate(tc, bb, Hp) > vmem_budget_bytes:
        tc = (tc + 1) // 2
    Tp = _round_up(T, tc)            # pad T up instead of shrinking tc to a divisor
    nt = Tp // tc
    est = _seq_vmem_estimate(tc, bb, Hp)
    vmem_limit = int(min(max(est + est // 4 + (4 << 20), 32 << 20), 100 << 20))

    # Hoisted input projection: one big bf16 MXU matmul (f32 accumulate), produced
    # directly in time-major layout so the kernel reads gx_ref[t] as a pure address offset.
    x_tbe = jnp.transpose(x_bte.astype(jnp.bfloat16), (1, 0, 2))    # (T, B, E) bf16
    if Tp != T:
        x_tbe = jnp.pad(x_tbe, ((0, Tp - T), (0, 0), (0, 0)))
    gx = (jnp.dot(x_tbe.reshape(Tp * B, E), w_ih_pad,
                  preferred_element_type=jnp.float32) + bias_pad)
    gx = gx.astype(jnp.bfloat16).reshape(Tp, B, G)

    kernel = functools.partial(_lstm_seq_kernel, hp=Hp, tc=tc,
                               t_valid=T, padded=(Tp != T))
    out_tbh, h_n, c_n = pl.pallas_call(
        kernel,
        grid=(nb, nt),
        in_specs=[
            pl.BlockSpec((tc, bb, G), lambda b, t: (t, b, 0)),      # gate pre-activations
            pl.BlockSpec(memory_space=pl.ANY),                      # W_hh^T stays in HBM
            pl.BlockSpec((bb, Hp), lambda b, t: (b, 0)),            # h0
            pl.BlockSpec((bb, Hp), lambda b, t: (b, 0)),            # c0
        ],
        out_specs=[
            pl.BlockSpec((tc, bb, Hp), lambda b, t: (t, b, 0)),     # per-chunk outputs
            pl.BlockSpec((bb, Hp), lambda b, t: (b, 0)),            # final hidden
            pl.BlockSpec((bb, Hp), lambda b, t: (b, 0)),            # final cell
        ],
        out_shape=[
            jax.ShapeDtypeStruct((Tp, B, Hp), x_bte.dtype),
            jax.ShapeDtypeStruct((B, Hp), jnp.float32),
            jax.ShapeDtypeStruct((B, Hp), jnp.float32),
        ],
        scratch_shapes=[
            pltpu.VMEM((Hp, G), jnp.bfloat16),                      # resident W_hh^T
            pltpu.VMEM((bb, Hp), jnp.float32),                      # h carry
            pltpu.VMEM((bb, Hp), jnp.float32),                      # c carry
            pltpu.SemaphoreType.DMA((1,)),
        ],
        compiler_params=pltpu.CompilerParams(
            dimension_semantics=("parallel", "arbitrary"),          # time is sequential
            vmem_limit_bytes=vmem_limit),
    )(gx, w_hh_pad, h0_pad, c0_pad)

    # Slice padded time / padded hidden lanes first, then one H-wide (not Hp-wide) transpose.
    out = jnp.transpose(out_tbh[:T, :, :h_real], (1, 0, 2))
    return out, h_n, c_n


# ---------------------------------------------------------------------------
# Single-step kernel for the streaming (T == 1) online path.
# ---------------------------------------------------------------------------
def _lstm_step_kernel(x_ref, w_ih_ref, w_hh_ref, b_ref, h_ref, c_ref,
                      h_out_ref, c_out_ref, *, hp):
    x16 = x_ref[...].astype(jnp.bfloat16)
    h16 = h_ref[...].astype(jnp.bfloat16)
    gates = (jnp.dot(x16, w_ih_ref[...], preferred_element_type=jnp.float32)
             + jnp.dot(h16, w_hh_ref[...], preferred_element_type=jnp.float32)
             + b_ref[...])
    i_g = jax.nn.sigmoid(gates[:, 0 * hp:1 * hp])
    f_g = jax.nn.sigmoid(gates[:, 1 * hp:2 * hp])
    g_g = jnp.tanh(gates[:, 2 * hp:3 * hp])
    o_g = jax.nn.sigmoid(gates[:, 3 * hp:4 * hp])
    c_new = f_g * c_ref[...] + i_g * g_g
    h_new = o_g * jnp.tanh(c_new)
    h_out_ref[...] = h_new
    c_out_ref[...] = c_new


@functools.partial(jax.jit, static_argnames=("hp",), donate_argnums=(4, 5))
def _lstm_step(x_be, w_ih_pad, w_hh_pad, bias_pad, h_pad, c_pad, *, hp):
    B = x_be.shape[0]
    est = (x_be.size * 4 + w_ih_pad.size * 2 + w_hh_pad.size * 2
           + bias_pad.size * 4 + 8 * B * hp * 4)
    vmem_limit = int(min(max(est + est // 2 + (4 << 20), 16 << 20), 96 << 20))
    return pl.pallas_call(
        functools.partial(_lstm_step_kernel, hp=hp),
        out_shape=[jax.ShapeDtypeStruct((B, hp), jnp.float32),
                   jax.ShapeDtypeStruct((B, hp), jnp.float32)],
        in_specs=[pl.BlockSpec(memory_space=pltpu.MemorySpace.VMEM)] * 6,
        out_specs=[pl.BlockSpec(memory_space=pltpu.MemorySpace.VMEM)] * 2,
        # New state overwrites the old state buffers in place (no extra HBM round-trip).
        input_output_aliases={4: 0, 5: 1},
        compiler_params=pltpu.CompilerParams(vmem_limit_bytes=vmem_limit),
    )(x_be, w_ih_pad, w_hh_pad, bias_pad, h_pad, c_pad)


# ---------------------------------------------------------------------------
# Module wrapper
# ---------------------------------------------------------------------------
class OnlineLanguageModel:
    """JAX/Pallas port of OnlineLanguageModel (uni-directional, stateful LSTM)."""

    def __init__(self, dim_in, dim_out, key, *, time_block=32, batch_block=None,
                 vmem_budget_bytes=32 * 1024 * 1024):
        self.dim_in = dim_in
        self.dim_out = dim_out
        self.num_directions = 1
        self.hidden_size = dim_out // self.num_directions
        self.time_block = time_block
        self.batch_block = batch_block          # set to B//2 (multiple of 8) on v7x megacore
        self.vmem_budget_bytes = vmem_budget_bytes

        H, E = self.hidden_size, self.dim_in
        Hp = _round_up(max(H, 1), 128)          # lane-aligned gate slab width
        self.hp = Hp

        k = 1.0 / np.sqrt(H)
        k0, k1, k2, k3 = jax.random.split(key, 4)
        # PyTorch nn.LSTM parameter shapes, uniform(-1/sqrt(H), 1/sqrt(H)) init.
        w_ih = np.asarray(jax.random.uniform(k0, (4 * H, E), jnp.float32, -k, k))
        w_hh = np.asarray(jax.random.uniform(k1, (4 * H, H), jnp.float32, -k, k))
        b_ih = np.asarray(jax.random.uniform(k2, (4 * H,), jnp.float32, -k, k))
        b_hh = np.asarray(jax.random.uniform(k3, (4 * H,), jnp.float32, -k, k))

        # Unpadded transposed f32 params (used only by the pure-JAX reference check).
        self.w_ih_t = jnp.asarray(w_ih.T)                 # (E, 4H)
        self.w_hh_t = jnp.asarray(w_hh.T)                 # (H, 4H)
        self.bias = jnp.asarray((b_ih + b_hh)[None, :])   # (1, 4H)

        # Lane-aligned padded params: gate g occupies columns [g*Hp, g*Hp+H); padded
        # rows/cols are zero so padded hidden lanes stay exactly zero forever.
        # Stored in bf16 (f32 accumulation in the kernels, f32 state) per review.
        w_ih_pad = np.zeros((E, 4 * Hp), np.float32)
        w_hh_pad = np.zeros((Hp, 4 * Hp), np.float32)
        bias_pad = np.zeros((1, 4 * Hp), np.float32)
        for g in range(4):
            w_ih_pad[:, g * Hp:g * Hp + H] = w_ih[g * H:(g + 1) * H, :].T
            w_hh_pad[:H, g * Hp:g * Hp + H] = w_hh[g * H:(g + 1) * H, :].T
            bias_pad[0, g * Hp:g * Hp + H] = (b_ih[g * H:(g + 1) * H]
                                              + b_hh[g * H:(g + 1) * H])
        self.w_ih_pad = jnp.asarray(w_ih_pad, dtype=jnp.bfloat16)
        self.w_hh_pad = jnp.asarray(w_hh_pad, dtype=jnp.bfloat16)
        self.bias_pad = jnp.asarray(bias_pad)             # f32

        self._h_pad = None                      # padded (B, Hp) f32 device state
        self._c_pad = None
        self.reset_state()

    # --- state handling (PyTorch-like exposure, padded storage internally) ---
    def reset_state(self):
        self._h_pad = None
        self._c_pad = None

    @property
    def hidden(self):
        return None if self._h_pad is None else self._h_pad[:, :self.hidden_size]

    @property
    def cell(self):
        return None if self._c_pad is None else self._c_pad[:, :self.hidden_size]

    # --- LanguageModel training-path semantics ---
    def forward_sequence(self, in_feats):
        """(B, T, E) -> (B, T, dim_out), zero initial state, state not retained."""
        B = in_feats.shape[0]
        h0 = jnp.zeros((B, self.hp), jnp.float32)
        c0 = jnp.zeros((B, self.hp), jnp.float32)
        out, _, _ = lstm_sequence(in_feats, self.w_ih_pad, self.w_hh_pad,
                                  self.bias_pad, h0, c0,
                                  h_real=self.hidden_size,
                                  time_block=self.time_block,
                                  batch_block=self.batch_block,
                                  vmem_budget_bytes=self.vmem_budget_bytes)
        return out

    # --- OnlineLanguageModel eval semantics ---
    def __call__(self, in_feats):
        """(B, T, E) -> (B, T, dim_out), carrying hidden/cell state across calls."""
        B, T, _ = in_feats.shape
        if self._h_pad is None:
            self._h_pad = jnp.zeros((B, self.hp), jnp.float32)
        if self._c_pad is None:
            self._c_pad = jnp.zeros((B, self.hp), jnp.float32)

        if T == 1:
            # Fast streaming path: no transposes, one fused cell kernel, in-place state.
            h_new, c_new = _lstm_step(in_feats[:, 0, :], self.w_ih_pad,
                                      self.w_hh_pad, self.bias_pad,
                                      self._h_pad, self._c_pad, hp=self.hp)
            self._h_pad, self._c_pad = h_new, c_new
            return h_new[:, None, :self.hidden_size]

        out, h_n, c_n = lstm_sequence(in_feats, self.w_ih_pad, self.w_hh_pad,
                                      self.bias_pad, self._h_pad, self._c_pad,
                                      h_real=self.hidden_size,
                                      time_block=self.time_block,
                                      batch_block=self.batch_block,
                                      vmem_budget_bytes=self.vmem_budget_bytes)
        self._h_pad, self._c_pad = h_n, c_n
        return out


# ---------------------------------------------------------------------------
# Pure-JAX f32 reference (unpadded), for verification.
# ---------------------------------------------------------------------------
def _lstm_reference(x_bte, w_ih_t, w_hh_t, bias, h0, c0):
    H = h0.shape[-1]

    def step(carry, x_t):
        h, c = carry
        gates = (jnp.dot(x_t, w_ih_t, precision=jax.lax.Precision.HIGHEST)
                 + jnp.dot(h, w_hh_t, precision=jax.lax.Precision.HIGHEST)
                 + bias)
        i = jax.nn.sigmoid(gates[:, 0 * H:1 * H])
        f = jax.nn.sigmoid(gates[:, 1 * H:2 * H])
        g = jnp.tanh(gates[:, 2 * H:3 * H])
        o = jax.nn.sigmoid(gates[:, 3 * H:4 * H])
        c = f * c + i * g
        h = o * jnp.tanh(c)
        return (h, c), h

    (h_n, c_n), ys = jax.lax.scan(step, (h0, c0), jnp.transpose(x_bte, (1, 0, 2)))
    return jnp.transpose(ys, (1, 0, 2)), h_n, c_n


if __name__ == "__main__":
    B, T, dim_in, dim_out = 2, 8, 32, 32

    key = jax.random.PRNGKey(0)
    k_param, k_x = jax.random.split(key)
    # time_block=4 exercises both the multi-chunk (T=8) and the zero-padded (T=5) paths.
    model = OnlineLanguageModel(dim_in, dim_out, k_param, time_block=4)

    x = jax.random.normal(k_x, (B, T, dim_in), jnp.float32)

    # --- Full-sequence path (LanguageModel / training semantics) ---
    out_seq = jax.block_until_ready(model.forward_sequence(x))

    # --- Online per-frame path (OnlineLanguageModel eval semantics) ---
    model.reset_state()
    online_chunks = []
    for t in range(T):
        online_chunks.append(model(x[:, t:t + 1, :]))          # (B, 1, E) frames
    out_online = jax.block_until_ready(jnp.concatenate(online_chunks, axis=1))
    h_online, c_online = model.hidden, model.cell

    # --- Online multi-frame chunks (T=5 exercises padded time, T=3 a tiny chunk) ---
    model.reset_state()
    out_a = model(x[:, :5, :])
    out_b = model(x[:, 5:, :])
    out_chunked = jax.block_until_ready(jnp.concatenate([out_a, out_b], axis=1))

    # --- Verify against pure-JAX f32 reference (bf16 weights/gx -> relaxed tolerance) ---
    h0 = jnp.zeros((B, model.hidden_size), jnp.float32)
    c0 = jnp.zeros((B, model.hidden_size), jnp.float32)
    ref_out, ref_h, ref_c = _lstm_reference(x, model.w_ih_t, model.w_hh_t,
                                            model.bias, h0, c0)

    TOL = dict(rtol=3e-2, atol=3e-2)
    np.testing.assert_allclose(np.asarray(out_seq), np.asarray(ref_out), **TOL)
    np.testing.assert_allclose(np.asarray(out_online), np.asarray(ref_out), **TOL)
    np.testing.assert_allclose(np.asarray(out_chunked), np.asarray(ref_out), **TOL)
    np.testing.assert_allclose(np.asarray(h_online), np.asarray(ref_h), **TOL)
    np.testing.assert_allclose(np.asarray(c_online), np.asarray(ref_c), **TOL)
    np.testing.assert_allclose(np.asarray(model.hidden), np.asarray(ref_h), **TOL)
    np.testing.assert_allclose(np.asarray(model.cell), np.asarray(ref_c), **TOL)

    print("KERNEL_OK")
</pallas_src>

<mosaic_0001>
module attributes {stable_mosaic.version = 11 : i64} {
  func.func @_lstm_seq_kernel(%arg0: i32, %arg1: i32, %arg2: memref<4x2x512xbf16, #tpu.memory_space<vmem>>, %arg3: memref<128x512xbf16, #tpu.memory_space<any>>, %arg4: memref<2x128xf32, #tpu.memory_space<vmem>>, %arg5: memref<2x128xf32, #tpu.memory_space<vmem>>, %arg6: memref<4x2x128xf32, #tpu.memory_space<vmem>>, %arg7: memref<2x128xf32, #tpu.memory_space<vmem>>, %arg8: memref<2x128xf32, #tpu.memory_space<vmem>>, %arg9: memref<128x512xbf16, #tpu.memory_space<vmem>>, %arg10: memref<2x128xf32, #tpu.memory_space<vmem>>, %arg11: memref<2x128xf32, #tpu.memory_space<vmem>>, %arg12: memref<1x!tpu.dma_semaphore, #tpu.memory_space<semaphore_mem>>) attributes {dimension_semantics = [#tpu.dimension_semantics<parallel>, #tpu.dimension_semantics<arbitrary>], iteration_bounds = array<i64: 1, 2>, scalar_prefetch = 0 : i64, scratch_operands = 4 : i64, tpu.core_type = #tpu.core_type<tc>, window_params = [{transform_indices = @transform_0, window_bounds = array<i64: 4, 2, 512>}, {}, {transform_indices = @transform_2, window_bounds = array<i64: 2, 128>}, {transform_indices = @transform_3, window_bounds = array<i64: 2, 128>}, {transform_indices = @transform_4, window_bounds = array<i64: 4, 2, 128>}, {transform_indices = @transform_5, window_bounds = array<i64: 2, 128>}, {transform_indices = @transform_6, window_bounds = array<i64: 2, 128>}]} {
    %c0_i32 = arith.constant 0 : i32
    %0 = arith.cmpi eq, %arg1, %c0_i32 : i32
    %1 = arith.extui %0 : i1 to i32
    %c0_i32_0 = arith.constant 0 : i32
    %2 = arith.cmpi ne, %1, %c0_i32_0 : i32
    scf.if %2 {
      %c0_i32_50 = arith.constant 0 : i32
      %158 = tpu.memref_slice %arg12[%c0_i32_50] : memref<1x!tpu.dma_semaphore, #tpu.memory_space<semaphore_mem>> -> memref<1x!tpu.dma_semaphore, #tpu.memory_space<semaphore_mem>>
      %159 = tpu.memref_squeeze %158 : memref<1x!tpu.dma_semaphore, #tpu.memory_space<semaphore_mem>> -> memref<!tpu.dma_semaphore, #tpu.memory_space<semaphore_mem>>
      tpu.enqueue_dma source(%arg3 : memref<128x512xbf16, #tpu.memory_space<any>>) target(%arg9 : memref<128x512xbf16, #tpu.memory_space<vmem>>) target_semaphore(%159 : memref<!tpu.dma_semaphore, #tpu.memory_space<semaphore_mem>>)
      %c0_51 = arith.constant 0 : index
      %c0_52 = arith.constant 0 : index
      %160 = vector.load %arg4[%c0_51, %c0_52] : memref<2x128xf32, #tpu.memory_space<vmem>>, vector<2x128xf32>
      %c0_53 = arith.constant 0 : index
      %c0_54 = arith.constant 0 : index
      %161 = vector.load %arg10[%c0_53, %c0_54] : memref<2x128xf32, #tpu.memory_space<vmem>>, vector<2x128xf32>
      tpu.vector_store %arg10[%c0_53, %c0_54], %160 {strides = array<i32>} : memref<2x128xf32, #tpu.memory_space<vmem>>, vector<2x128xf32>,
      %c0_55 = arith.constant 0 : index
      %c0_56 = arith.constant 0 : index
      %162 = vector.load %arg5[%c0_55, %c0_56] : memref<2x128xf32, #tpu.memory_space<vmem>>, vector<2x128xf32>
      %c0_57 = arith.constant 0 : index
      %c0_58 = arith.constant 0 : index
      %163 = vector.load %arg11[%c0_57, %c0_58] : memref<2x128xf32, #tpu.memory_space<vmem>>, vector<2x128xf32>
      tpu.vector_store %arg11[%c0_57, %c0_58], %162 {strides = array<i32>} : memref<2x128xf32, #tpu.memory_space<vmem>>, vector<2x128xf32>,
      %c0_i32_59 = arith.constant 0 : i32
      %164 = tpu.memref_slice %arg12[%c0_i32_59] : memref<1x!tpu.dma_semaphore, #tpu.memory_space<semaphore_mem>> -> memref<1x!tpu.dma_semaphore, #tpu.memory_space<semaphore_mem>>
      %165 = tpu.memref_squeeze %164 : memref<1x!tpu.dma_semaphore, #tpu.memory_space<semaphore_mem>> -> memref<!tpu.dma_semaphore, #tpu.memory_space<semaphore_mem>>
      tpu.wait_dma2 semaphore(%165 : memref<!tpu.dma_semaphore, #tpu.memory_space<semaphore_mem>>) src(%arg3 : memref<128x512xbf16, #tpu.memory_space<any>>) dst(%arg9 : memref<128x512xbf16, #tpu.memory_space<vmem>>)
    } else {
    }
    %c0 = arith.constant 0 : index
    %c0_1 = arith.constant 0 : index
    %3 = vector.load %arg10[%c0, %c0_1] : memref<2x128xf32, #tpu.memory_space<vmem>>, vector<2x128xf32>
    %c0_2 = arith.constant 0 : index
    %c0_3 = arith.constant 0 : index
    %4 = vector.load %arg11[%c0_2, %c0_3] : memref<2x128xf32, #tpu.memory_space<vmem>>, vector<2x128xf32>
    %c0_i32_4 = arith.constant 0 : i32
    %5 = arith.index_cast %c0_i32_4 : i32 to index
    %c0_5 = arith.constant 0 : index
    %c0_6 = arith.constant 0 : index
    %6 = vector.load %arg2[%5, %c0_5, %c0_6] : memref<4x2x512xbf16, #tpu.memory_space<vmem>>, vector<1x2x512xbf16>
    %7 = vector.shape_cast %6 : vector<1x2x512xbf16> to vector<2x512xbf16>
    %8 = arith.extf %7 : vector<2x512xbf16> to vector<2x512xf32>
    %9 = arith.truncf %3 : vector<2x128xf32> to vector<2x128xbf16>
    %c0_7 = arith.constant 0 : index
    %c0_8 = arith.constant 0 : index
    %10 = vector.load %arg9[%c0_7, %c0_8] : memref<128x512xbf16, #tpu.memory_space<vmem>>, vector<128x512xbf16>
    %cst = arith.constant dense<0.000000e+00> : vector<2x512xf32>
    %11 = tpu.matmul %9, %10, %cst {dimension_numbers = #tpu.dot_dimension_numbers<[1], [0], [0], [1], [0, 0, 1, 1], [], []>} : vector<2x128xbf16>, vector<128x512xbf16>, vector<2x512xf32> -> vector<2x512xf32>
    %12 = arith.addf %8, %11 : vector<2x512xf32>
    %13 = vector.extract_strided_slice %12 {offsets = [0, 0], sizes = [2, 128], strides = [1, 1]} : vector<2x512xf32> to vector<2x128xf32>
    %14 = arith.negf %13 : vector<2x128xf32>
    %15 = math.exp %14 : vector<2x128xf32>
    %cst_9 = arith.constant 1.000000e+00 : f32
    %16 = vector.broadcast %cst_9 : f32 to vector<2x128xf32>
    %17 = arith.addf %16, %15 : vector<2x128xf32>
    %18 = arith.divf %16, %17 : vector<2x128xf32>
    %19 = vector.extract_strided_slice %12 {offsets = [0, 128], sizes = [2, 128], strides = [1, 1]} : vector<2x512xf32> to vector<2x128xf32>
    %20 = arith.negf %19 : vector<2x128xf32>
    %21 = math.exp %20 : vector<2x128xf32>
    %cst_10 = arith.constant 1.000000e+00 : f32
    %22 = vector.broadcast %cst_10 : f32 to vector<2x128xf32>
    %23 = arith.addf %22, %21 : vector<2x128xf32>
    %24 = arith.divf %22, %23 : vector<2x128xf32>
    %25 = vector.extract_strided_slice %12 {offsets = [0, 256], sizes = [2, 128], strides = [1, 1]} : vector<2x512xf32> to vector<2x128xf32>
    %26 = math.tanh %25 : vector<2x128xf32>
    %27 = vector.extract_strided_slice %12 {offsets = [0, 384], sizes = [2, 128], strides = [1, 1]} : vector<2x512xf32> to vector<2x128xf32>
    %28 = arith.negf %27 : vector<2x128xf32>
    %29 = math.exp %28 : vector<2x128xf32>
    %cst_11 = arith.constant 1.000000e+00 : f32
    %30 = vector.broadcast %cst_11 : f32 to vector<2x128xf32>
    %31 = arith.addf %30, %29 : vector<2x128xf32>
    %32 = arith.divf %30, %31 : vector<2x128xf32>
    %33 = arith.mulf %24, %4 : vector<2x128xf32>
    %34 = arith.mulf %18, %26 : vector<2x128xf32>
    %35 = arith.addf %33, %34 : vector<2x128xf32>
    %36 = math.tanh %35 : vector<2x128xf32>
    %37 = arith.mulf %32, %36 : vector<2x128xf32>
    %38 = arith.index_cast %c0_i32_4 : i32 to index
    %c0_12 = arith.constant 0 : index
    %c0_13 = arith.constant 0 : index
    %39 = vector.load %arg6[%38, %c0_12, %c0_13] : memref<4x2x128xf32, #tpu.memory_space<vmem>>, vector<1x2x128xf32>
    %40 = vector.shape_cast %39 : vector<1x2x128xf32> to vector<2x128xf32>
    %41 = vector.shape_cast %37 : vector<2x128xf32> to vector<1x2x128xf32>
    tpu.vector_store %arg6[%38, %c0_12, %c0_13], %41 {strides = array<i32>} : memref<4x2x128xf32, #tpu.memory_space<vmem>>, vector<1x2x128xf32>,
    %c1_i32 = arith.constant 1 : i32
    %42 = arith.index_cast %c1_i32 : i32 to index
    %c0_14 = arith.constant 0 : index
    %c0_15 = arith.constant 0 : index
    %43 = vector.load %arg2[%42, %c0_14, %c0_15] : memref<4x2x512xbf16, #tpu.memory_space<vmem>>, vector<1x2x512xbf16>
    %44 = vector.shape_cast %43 : vector<1x2x512xbf16> to vector<2x512xbf16>
    %45 = arith.extf %44 : vector<2x512xbf16> to vector<2x512xf32>
    %46 = arith.truncf %37 : vector<2x128xf32> to vector<2x128xbf16>
    %c0_16 = arith.constant 0 : index
    %c0_17 = arith.constant 0 : index
    %47 = vector.load %arg9[%c0_16, %c0_17] : memref<128x512xbf16, #tpu.memory_space<vmem>>, vector<128x512xbf16>
    %cst_18 = arith.constant dense<0.000000e+00> : vector<2x512xf32>
    %48 = tpu.matmul %46, %47, %cst_18 {dimension_numbers = #tpu.dot_dimension_numbers<[1], [0], [0], [1], [0, 0, 1, 1], [], []>} : vector<2x128xbf16>, vector<128x512xbf16>, vector<2x512xf32> -> vector<2x512xf32>
    %49 = arith.addf %45, %48 : vector<2x512xf32>
    %50 = vector.extract_strided_slice %49 {offsets = [0, 0], sizes = [2, 128], strides = [1, 1]} : vector<2x512xf32> to vector<2x128xf32>
    %51 = arith.negf %50 : vector<2x128xf32>
    %52 = math.exp %51 : vector<2x128xf32>
    %cst_19 = arith.constant 1.000000e+00 : f32
    %53 = vector.broadcast %cst_19 : f32 to vector<2x128xf32>
    %54 = arith.addf %53, %52 : vector<2x128xf32>
    %55 = arith.divf %53, %54 : vector<2x128xf32>
    %56 = vector.extract_strided_slice %49 {offsets = [0, 128], sizes = [2, 128], strides = [1, 1]} : vector<2x512xf32> to vector<2x128xf32>
    %57 = arith.negf %56 : vector<2x128xf32>
    %58 = math.exp %57 : vector<2x128xf32>
    %cst_20 = arith.constant 1.000000e+00 : f32
    %59 = vector.broadcast %cst_20 : f32 to vector<2x128xf32>
    %60 = arith.addf %59, %58 : vector<2x128xf32>
    %61 = arith.divf %59, %60 : vector<2x128xf32>
    %62 = vector.extract_strided_slice %49 {offsets = [0, 256], sizes = [2, 128], strides = [1, 1]} : vector<2x512xf32> to vector<2x128xf32>
    %63 = math.tanh %62 : vector<2x128xf32>
    %64 = vector.extract_strided_slice %49 {offsets = [0, 384], sizes = [2, 128], strides = [1, 1]} : vector<2x512xf32> to vector<2x128xf32>
    %65 = arith.negf %64 : vector<2x128xf32>
    %66 = math.exp %65 : vector<2x128xf32>
    %cst_21 = arith.constant 1.000000e+00 : f32
    %67 = vector.broadcast %cst_21 : f32 to vector<2x128xf32>
    %68 = arith.addf %67, %66 : vector<2x128xf32>
    %69 = arith.divf %67, %68 : vector<2x128xf32>
    %70 = arith.mulf %61, %35 : vector<2x128xf32>
    %71 = arith.mulf %55, %63 : vector<2x128xf32>
    %72 = arith.addf %70, %71 : vector<2x128xf32>
    %73 = math.tanh %72 : vector<2x128xf32>
    %74 = arith.mulf %69, %73 : vector<2x128xf32>
    %75 = arith.index_cast %c1_i32 : i32 to index
    %c0_22 = arith.constant 0 : index
    %c0_23 = arith.constant 0 : index
    %76 = vector.load %arg6[%75, %c0_22, %c0_23] : memref<4x2x128xf32, #tpu.memory_space<vmem>>, vector<1x2x128xf32>
    %77 = vector.shape_cast %76 : vector<1x2x128xf32> to vector<2x128xf32>
    %78 = vector.shape_cast %74 : vector<2x128xf32> to vector<1x2x128xf32>
    tpu.vector_store %arg6[%75, %c0_22, %c0_23], %78 {strides = array<i32>} : memref<4x2x128xf32, #tpu.memory_space<vmem>>, vector<1x2x128xf32>,
    %c2_i32 = arith.constant 2 : i32
    %79 = arith.index_cast %c2_i32 : i32 to index
    %c0_24 = arith.constant 0 : index
    %c0_25 = arith.constant 0 : index
    %80 = vector.load %arg2[%79, %c0_24, %c0_25] : memref<4x2x512xbf16, #tpu.memory_space<vmem>>, vector<1x2x512xbf16>
    %81 = vector.shape_cast %80 : vector<1x2x512xbf16> to vector<2x512xbf16>
    %82 = arith.extf %81 : vector<2x512xbf16> to vector<2x512xf32>
    %83 = arith.truncf %74 : vector<2x128xf32> to vector<2x128xbf16>
    %c0_26 = arith.constant 0 : index
    %c0_27 = arith.constant 0 : index
    %84 = vector.load %arg9[%c0_26, %c0_27] : memref<128x512xbf16, #tpu.memory_space<vmem>>, vector<128x512xbf16>
    %cst_28 = arith.constant dense<0.000000e+00> : vector<2x512xf32>
    %85 = tpu.matmul %83, %84, %cst_28 {dimension_numbers = #tpu.dot_dimension_numbers<[1], [0], [0], [1], [0, 0, 1, 1], [], []>} : vector<2x128xbf16>, vector<128x512xbf16>, vector<2x512xf32> -> vector<2x512xf32>
    %86 = arith.addf %82, %85 : vector<2x512xf32>
    %87 = vector.extract_strided_slice %86 {offsets = [0, 0], sizes = [2, 128], strides = [1, 1]} : vector<2x512xf32> to vector<2x128xf32>
    %88 = arith.negf %87 : vector<2x128xf32>
    %89 = math.exp %88 : vector<2x128xf32>
    %cst_29 = arith.constant 1.000000e+00 : f32
    %90 = vector.broadcast %cst_29 : f32 to vector<2x128xf32>
    %91 = arith.addf %90, %89 : vector<2x128xf32>
    %92 = arith.divf %90, %91 : vector<2x128xf32>
    %93 = vector.extract_strided_slice %86 {offsets = [0, 128], sizes = [2, 128], strides = [1, 1]} : vector<2x512xf32> to vector<2x128xf32>
    %94 = arith.negf %93 : vector<2x128xf32>
    %95 = math.exp %94 : vector<2x128xf32>
    %cst_30 = arith.constant 1.000000e+00 : f32
    %96 = vector.broadcast %cst_30 : f32 to vector<2x128xf32>
    %97 = arith.addf %96, %95 : vector<2x128xf32>
    %98 = arith.divf %96, %97 : vector<2x128xf32>
    %99 = vector.extract_strided_slice %86 {offsets = [0, 256], sizes = [2, 128], strides = [1, 1]} : vector<2x512xf32> to vector<2x128xf32>
    %100 = math.tanh %99 : vector<2x128xf32>
    %101 = vector.extract_strided_slice %86 {offsets = [0, 384], sizes = [2, 128], strides = [1, 1]} : vector<2x512xf32> to vector<2x128xf32>
    %102 = arith.negf %101 : vector<2x128xf32>
    %103 = math.exp %102 : vector<2x128xf32>
    %cst_31 = arith.constant 1.000000e+00 : f32
    %104 = vector.broadcast %cst_31 : f32 to vector<2x128xf32>
    %105 = arith.addf %104, %103 : vector<2x128xf32>
    %106 = arith.divf %104, %105 : vector<2x128xf32>
    %107 = arith.mulf %98, %72 : vector<2x128xf32>
    %108 = arith.mulf %92, %100 : vector<2x128xf32>
    %109 = arith.addf %107, %108 : vector<2x128xf32>
    %110 = math.tanh %109 : vector<2x128xf32>
    %111 = arith.mulf %106, %110 : vector<2x128xf32>
    %112 = arith.index_cast %c2_i32 : i32 to index
    %c0_32 = arith.constant 0 : index
    %c0_33 = arith.constant 0 : index
    %113 = vector.load %arg6[%112, %c0_32, %c0_33] : memref<4x2x128xf32, #tpu.memory_space<vmem>>, vector<1x2x128xf32>
    %114 = vector.shape_cast %113 : vector<1x2x128xf32> to vector<2x128xf32>
    %115 = vector.shape_cast %111 : vector<2x128xf32> to vector<1x2x128xf32>
    tpu.vector_store %arg6[%112, %c0_32, %c0_33], %115 {strides = array<i32>} : memref<4x2x128xf32, #tpu.memory_space<vmem>>, vector<1x2x128xf32>,
    %c3_i32 = arith.constant 3 : i32
    %116 = arith.index_cast %c3_i32 : i32 to index
    %c0_34 = arith.constant 0 : index
    %c0_35 = arith.constant 0 : index
    %117 = vector.load %arg2[%116, %c0_34, %c0_35] : memref<4x2x512xbf16, #tpu.memory_space<vmem>>, vector<1x2x512xbf16>
    %118 = vector.shape_cast %117 : vector<1x2x512xbf16> to vector<2x512xbf16>
    %119 = arith.extf %118 : vector<2x512xbf16> to vector<2x512xf32>
    %120 = arith.truncf %111 : vector<2x128xf32> to vector<2x128xbf16>
    %c0_36 = arith.constant 0 : index
    %c0_37 = arith.constant 0 : index
    %121 = vector.load %arg9[%c0_36, %c0_37] : memref<128x512xbf16, #tpu.memory_space<vmem>>, vector<128x512xbf16>
    %cst_38 = arith.constant dense<0.000000e+00> : vector<2x512xf32>
    %122 = tpu.matmul %120, %121, %cst_38 {dimension_numbers = #tpu.dot_dimension_numbers<[1], [0], [0], [1], [0, 0, 1, 1], [], []>} : vector<2x128xbf16>, vector<128x512xbf16>, vector<2x512xf32> -> vector<2x512xf32>
    %123 = arith.addf %119, %122 : vector<2x512xf32>
    %124 = vector.extract_strided_slice %123 {offsets = [0, 0], sizes = [2, 128], strides = [1, 1]} : vector<2x512xf32> to vector<2x128xf32>
    %125 = arith.negf %124 : vector<2x128xf32>
    %126 = math.exp %125 : vector<2x128xf32>
    %cst_39 = arith.constant 1.000000e+00 : f32
    %127 = vector.broadcast %cst_39 : f32 to vector<2x128xf32>
    %128 = arith.addf %127, %126 : vector<2x128xf32>
    %129 = arith.divf %127, %128 : vector<2x128xf32>
    %130 = vector.extract_strided_slice %123 {offsets = [0, 128], sizes = [2, 128], strides = [1, 1]} : vector<2x512xf32> to vector<2x128xf32>
    %131 = arith.negf %130 : vector<2x128xf32>
    %132 = math.exp %131 : vector<2x128xf32>
    %cst_40 = arith.constant 1.000000e+00 : f32
    %133 = vector.broadcast %cst_40 : f32 to vector<2x128xf32>
    %134 = arith.addf %133, %132 : vector<2x128xf32>
    %135 = arith.divf %133, %134 : vector<2x128xf32>
    %136 = vector.extract_strided_slice %123 {offsets = [0, 256], sizes = [2, 128], strides = [1, 1]} : vector<2x512xf32> to vector<2x128xf32>
    %137 = math.tanh %136 : vector<2x128xf32>
    %138 = vector.extract_strided_slice %123 {offsets = [0, 384], sizes = [2, 128], strides = [1, 1]} : vector<2x512xf32> to vector<2x128xf32>
    %139 = arith.negf %138 : vector<2x128xf32>
    %140 = math.exp %139 : vector<2x128xf32>
    %cst_41 = arith.constant 1.000000e+00 : f32
    %141 = vector.broadcast %cst_41 : f32 to vector<2x128xf32>
    %142 = arith.addf %141, %140 : vector<2x128xf32>
    %143 = arith.divf %141, %142 : vector<2x128xf32>
    %144 = arith.mulf %135, %109 : vector<2x128xf32>
    %145 = arith.mulf %129, %137 : vector<2x128xf32>
    %146 = arith.addf %144, %145 : vector<2x128xf32>
    %147 = math.tanh %146 : vector<2x128xf32>
    %148 = arith.mulf %143, %147 : vector<2x128xf32>
    %149 = arith.index_cast %c3_i32 : i32 to index
    %c0_42 = arith.constant 0 : index
    %c0_43 = arith.constant 0 : index
    %150 = vector.load %arg6[%149, %c0_42, %c0_43] : memref<4x2x128xf32, #tpu.memory_space<vmem>>, vector<1x2x128xf32>
    %151 = vector.shape_cast %150 : vector<1x2x128xf32> to vector<2x128xf32>
    %152 = vector.shape_cast %148 : vector<2x128xf32> to vector<1x2x128xf32>
    tpu.vector_store %arg6[%149, %c0_42, %c0_43], %152 {strides = array<i32>} : memref<4x2x128xf32, #tpu.memory_space<vmem>>, vector<1x2x128xf32>,
    %c4_i32 = arith.constant 4 : i32
    %c0_44 = arith.constant 0 : index
    %c0_45 = arith.constant 0 : index
    %153 = vector.load %arg10[%c0_44, %c0_45] : memref<2x128xf32, #tpu.memory_space<vmem>>, vector<2x128xf32>
    tpu.vector_store %arg10[%c0_44, %c0_45], %148 {strides = array<i32>} : memref<2x128xf32, #tpu.memory_space<vmem>>, vector<2x128xf32>,
    %c0_46 = arith.constant 0 : index
    %c0_47 = arith.constant 0 : index
    %154 = vector.load %arg11[%c0_46, %c0_47] : memref<2x128xf32, #tpu.memory_space<vmem>>, vector<2x128xf32>
    tpu.vector_store %arg11[%c0_46, %c0_47], %146 {strides = array<i32>} : memref<2x128xf32, #tpu.memory_space<vmem>>, vector<2x128xf32>,
    %c1_i32_48 = arith.constant 1 : i32
    %155 = arith.cmpi eq, %arg1, %c1_i32_48 : i32
    %156 = arith.extui %155 : i1 to i32
    %c0_i32_49 = arith.constant 0 : i32
    %157 = arith.cmpi ne, %156, %c0_i32_49 : i32
    scf.if %157 {
      %c0_50 = arith.constant 0 : index
      %c0_51 = arith.constant 0 : index
      %158 = vector.load %arg7[%c0_50, %c0_51] : memref<2x128xf32, #tpu.memory_space<vmem>>, vector<2x128xf32>
      tpu.vector_store %arg7[%c0_50, %c0_51], %148 {strides = array<i32>} : memref<2x128xf32, #tpu.memory_space<vmem>>, vector<2x128xf32>,
      %c0_52 = arith.constant 0 : index
      %c0_53 = arith.constant 0 : index
      %159 = vector.load %arg8[%c0_52, %c0_53] : memref<2x128xf32, #tpu.memory_space<vmem>>, vector<2x128xf32>
      tpu.vector_store %arg8[%c0_52, %c0_53], %146 {strides = array<i32>} : memref<2x128xf32, #tpu.memory_space<vmem>>, vector<2x128xf32>,
    } else {
    }
    return
  }
  func.func @transform_0(%arg0: i32, %arg1: i32) -> (i32, i32, i32) {
    %c0_i32 = arith.constant 0 : i32
    %c0_i32_0 = arith.constant 0 : i32
    return %arg1, %arg0, %c0_i32 : i32, i32, i32
  }
  func.func @transform_2(%arg0: i32, %arg1: i32) -> (i32, i32) {
    %c0_i32 = arith.constant 0 : i32
    %c0_i32_0 = arith.constant 0 : i32
    return %arg0, %c0_i32 : i32, i32
  }
  func.func @transform_3(%arg0: i32, %arg1: i32) -> (i32, i32) {
    %c0_i32 = arith.constant 0 : i32
    %c0_i32_0 = arith.constant 0 : i32
    return %arg0, %c0_i32 : i32, i32
  }
  func.func @transform_4(%arg0: i32, %arg1: i32) -> (i32, i32, i32) {
    %c0_i32 = arith.constant 0 : i32
    %c0_i32_0 = arith.constant 0 : i32
    return %arg1, %arg0, %c0_i32 : i32, i32, i32
  }
  func.func @transform_5(%arg0: i32, %arg1: i32) -> (i32, i32) {
    %c0_i32 = arith.constant 0 : i32
    %c0_i32_0 = arith.constant 0 : i32
    return %arg0, %c0_i32 : i32, i32
  }
  func.func @transform_6(%arg0: i32, %arg1: i32) -> (i32, i32) {
    %c0_i32 = arith.constant 0 : i32
    %c0_i32_0 = arith.constant 0 : i32
    return %arg0, %c0_i32 : i32, i32
  }
}

</mosaic_0001>

<bundles_post_ra>
// kernel: lstm_sequence.1
= control target key start
LH: loop header
LB: loop body
LE: loop exit
PB: predicated region body
PF: predicated region fallthrough
CT: control target
= control target key end

     0   :  { %12 = vsyncpa [#allocation7], 0  ;;  %s1851_s0 = inlined_call_operand.vmem [shape: bf16[8,2,512], index: 0, kind: input, shape index: {}]   ;;  %s1852_s1 = inlined_call_operand.hbm [shape: bf16[128,512], index: 1, kind: input, shape index: {}]   ;;  %s1853_s2 = inlined_call_operand.vmem [shape: f32[2,128], index: 2, kind: input, shape index: {}]   ;;  %s1854_s3 = inlined_call_operand.vmem [shape: f32[2,128], index: 3, kind: input, shape index: {}]   ;;  %s1855_s4 = inlined_call_operand.vmem [shape: f32[8,2,128], index: 4, kind: output, shape index: {0}]   ;;  %s1856_s5 = inlined_call_operand.hbm [shape: f32[2,128], index: 5, kind: output, shape index: {1}]   ;;  %s1857_s6 = inlined_call_operand.hbm [shape: f32[2,128], index: 6, kind: output, shape index: {2}]  }
   0x1   :  { %13 = vsyncpa [#allocation9], 0  ;;  %s1514_s21 = smov 0   ;;  %s1516_s22 = smov 0  }
   0x2   :  { %s1518_s23 = smov 0  }
   0x3 LB: > { %s1227_s24 = sadd.s32 4294967295, %s1464_s23   ;;  %s28_s25 = sadd.s32 1, %s1460_s22  ;;  %s1464_s23 = sphi %s1518_s23, %s19_s23   ;;  %s1460_s22 = sphi %s1516_s22, %s1860_s22   ;;  %s1456_s21 = sphi %s1514_s21, %s1859_s21  }
   0x4   : > { %p29_p0 = scmp.ge.s32.totalorder %s28_s25, 2  ;;  %p1233_p1 = scmp.ge.s32.totalorder %s1464_s23, 1 }
   0x5   : > { %p234_p2 = scmp.lt.s32.totalorder %s1464_s23, 3 }
   0x6   : > { %s1862_s25 = smov (%p29_p0, %s28_s25), 0 }
   0x7   : > { %p235_p3 = pnand %p1233_p1, %p234_p2 }
   0x8   : > { %s1234_s26 = sshll.u32 (!%p235_p3), %s1456_s21, 2  ;;  %p1238_p5 = scmp.ne.s32.totalorder (!%p235_p3), %s1456_s21, 0 }
   0x9   : > { %238 = sbr.rel (%p235_p3) target bundleno = 1193 (0x4a9), region = 32  ;;  %p278_p4 = scmp.lt.s32.totalorder (!%p235_p3), %s1234_s26, 7 }
  0x10   : > { %s1864_s26 = smov (!%p278_p4, %s1234_s26), 7  ;;  %308 = sbr.rel (%p1238_p5) target bundleno = 40 (0x28), region = 36 }
  0x11   : > { %s1235_s27 = sshll.u32 %s1864_s26, 2  ;;  %s1237_s28 = sshll.u32 %s1864_s26, 1 }
  0x12   : > { %s1539_s7 = scalar_lea.vmem %s1851_s0, %s1235_s27  ;;  %s1544_s10 = scalar_lea.vmem %s1855_s4, %s1237_s28 }
  0x17   : > { %s313_s11 = sld [smem:[#allocation0]]   ;;  %s1466_s12 = smov [#allocation2]  }
  0x18   : > { %s321_s13 = sshll.u32 %s1466_s12, 4  ;;  %s1467_s14 = smov 512   ;;  %s322_s13 = int_to_ptr.vmem [resolvable:$true] %s321_s13 }
  0x19   : > { %325 = sst [smem:[#allocation11]] %s1467_s14  ;;  %s1468_s15 = smov 4  }
  0x1a   : > { %327 = sst [smem:[#allocation11 + $0x1]] %s1467_s14  ;;  %s1469_s16 = smov 64  }
  0x1b   : > { %329 = sst [smem:[#allocation11 + $0x2]] %s1468_s15  ;;  %s1470_s18 = smov 128  }
  0x1c   : > { %331 = sst [smem:[#allocation11 + $0x3]] %s1469_s16  ;;  %s1471_s20 = smov 2  }
  0x1d   : > { %s1239_s17 = sshll.u32 %s313_s11, 26  ;;  %333 = sst [smem:[#allocation11 + $0x4]] %s1470_s18 }
  0x1e   : > { %s1240_s19 = sadd.s32 134217728, %s1239_s17  ;;  %335 = sst [smem:[#allocation11 + $0x5]] %s1471_s20 }
  0x1f   : > { %s1472_s26 = smov 256   ;;  %339 = sst [smem:[#allocation11 + $0x7]] %s1469_s16 }
  0x20   : > { %337 = sst [smem:[#allocation11 + $0x6]] %s1472_s26  ;;  %s1473_s27 = smov [#allocation5]  }
  0x21   : > { %341 = sst [smem:[#allocation11 + $0x8]] %s1468_s15  ;;  %s1474_s28 = smov [#allocation10]  }
  0x22   : > { %343 = dma.general %s1852_s1, 4096, %s322_s13, %s1473_s27, %s1474_s28, [#allocation11], %s1240_s19, 0  }
  0x23   : > { %v344_v0 = vld [vmem:[%s1853_s2] sm:$0x3] }
  0x24   : > { %v346_v1 = vld [vmem:[%s1854_s3] sm:$0x3]  ;;  %345 = vst [vmem:[#allocation3] sm:$0x3] %v344_v0 }
  0x25   : > { %347 = vst [vmem:[#allocation4] sm:$0x3] %v346_v1 }
  0x26   : > { %1444 = dma.done.wait [#allocation5], 4096 }
  0x27   : > { %1445 = vsyncadd [#allocation5], 4294963200 }
  0x28 PF: > { %v1556_v2 = vld [vmem:[#allocation2 + $0x8] sm:$0xff]  ;;  %v1558_v3 = vld [vmem:[#allocation2 + $0x18] sm:$0xff]  ;;  %v1560_v4 = vld [vmem:[#allocation2] sm:$0xff]  ;;  %v1475_v12 = vmov 0   ;;  %v1476_v37 = vmov 1983009808   ;;  %v480_v39 = vlaneseq }
  0x29   : > { %389 = vmatprep.subr.bf16.mxu0 %v1556_v2  ;;  %430 = vmatprep.subr.bf16.mxu1 %v1558_v3  ;;  %v1564_v5 = vld [vmem:[#allocation2 + $0x10] sm:$0xff]  ;;  %v1566_v6 = vld [vmem:[#allocation2 + $0x28] sm:$0xff]  ;;  %v1568_v7 = vld [vmem:[#allocation2 + $0x38] sm:$0xff]  ;;  %v478_v38 = vunpack.c.l.s4 %v1476_v37  ;;  %p1259_p6 = scmp.ne.s32.totalorder %s1456_s21, 1 }
  0x2a   : > { %390 = vmatpush1.bf16.msra.mxu0 %v1560_v4  ;;  %431 = vmatpush1.bf16.msra.mxu1 %v1564_v5  ;;  %v1574_v8 = vld [vmem:[#allocation2 + $0x20] sm:$0xff]  ;;  %v1576_v9 = vld [vmem:[#allocation2 + $0x30] sm:$0xff]  ;;  %v1578_v10 = vld [vmem:[#allocation2 + $0x48] sm:$0xff]  ;;  %v481_v41 = vshrl.u32 %v480_v39, 7 }
  0x2b   : > { %391 = vmatprep.subr.bf16.mxu0 %v1566_v6  ;;  %432 = vmatprep.subr.bf16.mxu1 %v1568_v7  ;;  %v1580_v11 = vld [vmem:[#allocation2 + $0x58] sm:$0xff]  ;;  %v1588_v13 = vld [vmem:[#allocation2 + $0x40] sm:$0xff]  ;;  %v1590_v14 = vld [vmem:[#allocation2 + $0x50] sm:$0xff]  ;;  %v479_v40 = vunpack.c.0.s8 %v478_v38 }
  0x2c   : > { %421 = vmatprep.mubr.bf16.mxu0 %v1475_v12  ;;  %462 = vmatprep.mubr.bf16.mxu1 %v1475_v12  ;;  %v1592_v15 = vld [vmem:[#allocation2 + $0x68] sm:$0xff]  ;;  %v1594_v16 = vld [vmem:[#allocation2 + $0x78] sm:$0xff]  ;;  %v1600_v17 = vld [vmem:[#allocation2 + $0x60] sm:$0xff] }
  0x2d   : > { %v1602_v18 = vld [vmem:[#allocation2 + $0x70] sm:$0xff]  ;;  %v1604_v19 = vld [vmem:[#allocation2 + $0x88] sm:$0xff]  ;;  %v1606_v20 = vld [vmem:[#allocation2 + $0x98] sm:$0xff]  ;;  %v1690_v44 = vsub.s32 %v479_v40, %v481_v41 }
  0x2e   : > { %392 = vmatpush1.bf16.msra.mxu0 %v1574_v8  ;;  %433 = vmatpush1.bf16.msra.mxu1 %v1576_v9  ;;  %v1612_v21 = vld [vmem:[#allocation2 + $0x80] sm:$0xff]  ;;  %v1614_v22 = vld [vmem:[#allocation2 + $0x90] sm:$0xff]  ;;  %v1616_v23 = vld [vmem:[#allocation2 + $0xa8] sm:$0xff] }
  0x2f   : > { %393 = vmatprep.subr.bf16.mxu0 %v1578_v10  ;;  %434 = vmatprep.subr.bf16.mxu1 %v1580_v11  ;;  %v1618_v24 = vld [vmem:[#allocation2 + $0xb8] sm:$0xff]  ;;  %v1624_v25 = vld [vmem:[#allocation2 + $0xa0] sm:$0xff]  ;;  %v1626_v26 = vld [vmem:[#allocation2 + $0xb0] sm:$0xff] }
  0x30   : > { %v1628_v27 = vld [vmem:[#allocation2 + $0xc8] sm:$0xff]  ;;  %v1630_v28 = vld [vmem:[#allocation2 + $0xd8] sm:$0xff]  ;;  %v1636_v29 = vld [vmem:[#allocation2 + $0xc0] sm:$0xff] }
  0x31   : > { %v1638_v30 = vld [vmem:[#allocation2 + $0xd0] sm:$0xff]  ;;  %v1640_v31 = vld [vmem:[#allocation2 + $0xe8] sm:$0xff]  ;;  %v1642_v32 = vld [vmem:[#allocation2 + $0xf8] sm:$0xff] }
  0x32   : > { %394 = vmatpush1.bf16.msra.mxu0 %v1588_v13  ;;  %435 = vmatpush1.bf16.msra.mxu1 %v1590_v14  ;;  %v352_v33 = vld [vmem:[#allocation3] sm:$0x3]  ;;  %v1650_v35 = vld [vmem:[#allocation2 + $0xf0] sm:$0xff]  ;;  %v353_v40 = vld [vmem:[#allocation4] sm:$0x3] }
  0x33   : > { %395 = vmatprep.subr.bf16.mxu0 %v1592_v15  ;;  %436 = vmatprep.subr.bf16.mxu1 %v1594_v16  ;;  %v1648_v34 = vld [vmem:[#allocation2 + $0xe0] sm:$0xff]  ;;  %v356_v36 = vpack.c.bf16 %v352_v33, %v352_v33 }
  0x34   : > { %v1693_v46 = vld [vmem:[%s1539_s7] sm:$0xff]  }
  0x35   : > { %v355_v55 = vunpack.c.l.bf16 %v1693_v46 }
  0x36   : > { %396 = vmatpush1.bf16.msra.mxu0 %v1600_v17  ;;  %437 = vmatpush1.bf16.msra.mxu1 %v1602_v18 }
  0x37   : > { %397 = vmatprep.subr.bf16.mxu0 %v1604_v19  ;;  %438 = vmatprep.subr.bf16.mxu1 %v1606_v20 }
  0x3a   : > { %398 = vmatpush1.bf16.msra.mxu0 %v1612_v21  ;;  %439 = vmatpush1.bf16.msra.mxu1 %v1614_v22 }
  0x3b   : > { %399 = vmatprep.subr.bf16.mxu0 %v1616_v23  ;;  %440 = vmatprep.subr.bf16.mxu1 %v1618_v24 }
  0x3e   : > { %400 = vmatpush1.bf16.msra.mxu0 %v1624_v25  ;;  %441 = vmatpush1.bf16.msra.mxu1 %v1626_v26 }
  0x3f   : > { %401 = vmatprep.subr.bf16.mxu0 %v1628_v27  ;;  %442 = vmatprep.subr.bf16.mxu1 %v1630_v28 }
  0x42   : > { %402 = vmatpush1.bf16.msra.mxu0 %v1636_v29  ;;  %443 = vmatpush1.bf16.msra.mxu1 %v1638_v30 }
  0x43   : > { %403 = vmatprep.subr.bf16.mxu0 %v1640_v31  ;;  %444 = vmatprep.subr.bf16.mxu1 %v1642_v32 }
  0x46   : > { %404 = vmatpush1.bf16.msra.mxu0 %v1648_v34  ;;  %445 = vmatpush1.bf16.msra.mxu1 %v1650_v35 }
  0x47   : > { %562 = vmatprep.subr.bf16.mxu0 %v1556_v2  ;;  %603 = vmatprep.subr.bf16.mxu1 %v1558_v3 }
  0x49   : > { %422 = vmatmul.mubr.bf16.vlgmr.msra.gmra.mrb[0].mxu0 %v356_v36  ;;  %463 = vmatmul.mubr.bf16.vlgmr.msra.gmra.mrb[0].mxu1 %v356_v36 }
  0x4a   : > { %563 = vmatpush1.bf16.msra.mxu0 %v1560_v4  ;;  %604 = vmatpush1.bf16.msra.mxu1 %v1564_v5 }
  0x4b   : > { %564 = vmatprep.subr.bf16.mxu0 %v1566_v6  ;;  %605 = vmatprep.subr.bf16.mxu1 %v1568_v7 }
  0x4c   : > { %594 = vmatprep.mubr.bf16.mxu0 %v1475_v12  ;;  %635 = vmatprep.mubr.bf16.mxu1 %v1475_v12 }
  0x4e   : > { %565 = vmatpush1.bf16.msra.mxu0 %v1574_v8  ;;  %606 = vmatpush1.bf16.msra.mxu1 %v1576_v9 }
  0x4f   : > { %566 = vmatprep.subr.bf16.mxu0 %v1578_v10  ;;  %607 = vmatprep.subr.bf16.mxu1 %v1580_v11 }
  0x52   : > { %567 = vmatpush1.bf16.msra.mxu0 %v1588_v13  ;;  %608 = vmatpush1.bf16.msra.mxu1 %v1590_v14 }
  0x53   : > { %568 = vmatprep.subr.bf16.mxu0 %v1592_v15  ;;  %609 = vmatprep.subr.bf16.mxu1 %v1594_v16 }
  0x56   : > { %569 = vmatpush1.bf16.msra.mxu0 %v1600_v17  ;;  %610 = vmatpush1.bf16.msra.mxu1 %v1602_v18 }
  0x57   : > { %570 = vmatprep.subr.bf16.mxu0 %v1604_v19  ;;  %611 = vmatprep.subr.bf16.mxu1 %v1606_v20 }
  0x5a   : > { %571 = vmatpush1.bf16.msra.mxu0 %v1612_v21  ;;  %612 = vmatpush1.bf16.msra.mxu1 %v1614_v22 }
  0x5b   : > { %572 = vmatprep.subr.bf16.mxu0 %v1616_v23  ;;  %613 = vmatprep.subr.bf16.mxu1 %v1618_v24 }
  0x5e   : > { %573 = vmatpush1.bf16.msra.mxu0 %v1624_v25  ;;  %614 = vmatpush1.bf16.msra.mxu1 %v1626_v26 }
  0x5f   : > { %574 = vmatprep.subr.bf16.mxu0 %v1628_v27  ;;  %615 = vmatprep.subr.bf16.mxu1 %v1630_v28 }
  0x62   : > { %575 = vmatpush1.bf16.msra.mxu0 %v1636_v29  ;;  %616 = vmatpush1.bf16.msra.mxu1 %v1638_v30 }
  0x63   : > { %576 = vmatprep.subr.bf16.mxu0 %v1640_v31  ;;  %617 = vmatprep.subr.bf16.mxu1 %v1642_v32 }
  0x66   : > { %577 = vmatpush1.bf16.msra.mxu0 %v1648_v34  ;;  %618 = vmatpush1.bf16.msra.mxu1 %v1650_v35 }
  0x67   : > { %736 = vmatprep.subr.bf16.mxu0 %v1556_v2  ;;  %777 = vmatprep.subr.bf16.mxu1 %v1558_v3 }
 0x11c   : > { %v423_v42 = vpop.f32.mrb[0].mxu0  ;;  %v464_v43 = vpop.f32.mrb[0].mxu1 }
 0x11d   : > { %v425_v45 = vpop.f32.mrb[1].mxu0  ;;  %v466_v47 = vpop.f32.mrb[1].mxu1 }
 0x11e   : > { %v475_v48 = vcombine.low %v423_v42, %v425_v45  ;;  %v476_v49 = vcombine.low %v464_v43, %v466_v47  ;;  %v427_v50 = vpop.f32.mrb[2].mxu0  ;;  %v468_v51 = vpop.f32.mrb[2].mxu1 }
 0x11f   : > { %v428_v52 = vpop.f32.mrb[3].mxu0  ;;  %v469_v53 = vpop.f32.mrb[3].mxu1 }
 0x120   : > { %v483_v54 = vrot.slane %v475_v48, %v1690_v44  ;;  %v490_v56 = vrot.slane %v476_v49, %v1690_v44 }
 0x122   : > { %v491_v57 = vcombine.low %v483_v54, %v490_v56 }
 0x124   : > { %v493_v58 = vadd.f32 %v491_v57, %v355_v55 }
 0x126   : > { %v1241_v59 = vmul.f32 -1.442695, %v493_v58  ;;  %v501_v60 = vrot.slane %v493_v58, 2  ;;  %v512_v62 = vrot.slane %v493_v58, 6  ;;  %v509_v1 = vrot.slane %v493_v58, 4 }
 0x128   : > { %1316 = vpow2.f32 %v1241_v59  ;;  %v1242_v61 = vmul.f32 -1.442695, %v501_v60  ;;  %v1243_v63 = vmul.f32 -1.442695, %v512_v62 }
 0x12a   : > { %1318 = vpow2.f32 %v1242_v61 }
 0x12b   : > { %1320 = vpow2.f32 %v1243_v63 }
 0x132   : > { %v1317_v0 = vpop.eup %1316 }
 0x133   : > { %v497_v33 = vadd.f32 1.0, %v1317_v0  ;;  %v528_v0 = vunpack.c.h.bf16 %v1693_v46 }
 0x134   : > { %v1319_v36 = vpop.eup %1318 }
 0x135   : > { %1322 = vrcp.f32 %v497_v33  ;;  %v506_v37 = vadd.f32 1.0, %v1319_v36  ;;  %v1321_v38 = vpop.eup %1320 }
 0x136   : > { %1324 = vtanh.f32 %v509_v1  ;;  %v517_v43 = vadd.f32 1.0, %v1321_v38 }
 0x137   : > { %1326 = vrcp.f32 %v506_v37 }
 0x138   : > { %1328 = vrcp.f32 %v517_v43 }
 0x13f   : > { %v1323_v39 = vpop.eup %1322 }
 0x140   : > { %v1325_v41 = vpop.eup %1324 }
 0x141   : > { %v1327_v42 = vpop.eup %1326  ;;  %v521_v47 = vmul.f32 %v1325_v41, %v1323_v39 }
 0x142   : > { %v520_v45 = vmul.f32 %v1327_v42, %v353_v40  ;;  %v1329_v49 = vpop.eup %1328 }
 0x144   : > { %v1698_v48 = vadd.f32 %v521_v47, %v520_v45 }
 0x146   : > { %1330 = vtanh.f32 %v1698_v48 }
 0x150   : > { %v1331_v50 = vpop.eup %1330 }
 0x151   : > { %v524_v51 = vmul.f32 %v1331_v50, %v1329_v49 }
 0x153   : > { %525 = vst [vmem:[%s1544_s10] sm:$0x3] %v524_v51  ;;  %v529_v52 = vpack.c.bf16 %v524_v51, %v524_v51 }
 0x155   : > { %595 = vmatmul.mubr.bf16.vlgmr.msra.gmra.mrb[4].mxu0 %v529_v52  ;;  %636 = vmatmul.mubr.bf16.vlgmr.msra.gmra.mrb[4].mxu1 %v529_v52 }
 0x156   : > { %737 = vmatpush1.bf16.msra.mxu0 %v1560_v4  ;;  %778 = vmatpush1.bf16.msra.mxu1 %v1564_v5 }
 0x157   : > { %738 = vmatprep.subr.bf16.mxu0 %v1566_v6  ;;  %779 = vmatprep.subr.bf16.mxu1 %v1568_v7 }
 0x158   : > { %768 = vmatprep.mubr.bf16.mxu0 %v1475_v12  ;;  %809 = vmatprep.mubr.bf16.mxu1 %v1475_v12 }
 0x15a   : > { %739 = vmatpush1.bf16.msra.mxu0 %v1574_v8  ;;  %780 = vmatpush1.bf16.msra.mxu1 %v1576_v9 }
 0x15b   : > { %740 = vmatprep.subr.bf16.mxu0 %v1578_v10  ;;  %781 = vmatprep.subr.bf16.mxu1 %v1580_v11 }
 0x15e   : > { %741 = vmatpush1.bf16.msra.mxu0 %v1588_v13  ;;  %782 = vmatpush1.bf16.msra.mxu1 %v1590_v14 }
 0x15f   : > { %742 = vmatprep.subr.bf16.mxu0 %v1592_v15  ;;  %783 = vmatprep.subr.bf16.mxu1 %v1594_v16 }
 0x162   : > { %743 = vmatpush1.bf16.msra.mxu0 %v1600_v17  ;;  %784 = vmatpush1.bf16.msra.mxu1 %v1602_v18 }
 0x163   : > { %744 = vmatprep.subr.bf16.mxu0 %v1604_v19  ;;  %785 = vmatprep.subr.bf16.mxu1 %v1606_v20 }
 0x166   : > { %745 = vmatpush1.bf16.msra.mxu0 %v1612_v21  ;;  %786 = vmatpush1.bf16.msra.mxu1 %v1614_v22 }
 0x167   : > { %746 = vmatprep.subr.bf16.mxu0 %v1616_v23  ;;  %787 = vmatprep.subr.bf16.mxu1 %v1618_v24 }
 0x16a   : > { %747 = vmatpush1.bf16.msra.mxu0 %v1624_v25  ;;  %788 = vmatpush1.bf16.msra.mxu1 %v1626_v26 }
 0x16b   : > { %748 = vmatprep.subr.bf16.mxu0 %v1628_v27  ;;  %789 = vmatprep.subr.bf16.mxu1 %v1630_v28 }
 0x16e   : > { %749 = vmatpush1.bf16.msra.mxu0 %v1636_v29  ;;  %790 = vmatpush1.bf16.msra.mxu1 %v1638_v30 }
 0x16f   : > { %750 = vmatprep.subr.bf16.mxu0 %v1640_v31  ;;  %791 = vmatprep.subr.bf16.mxu1 %v1642_v32 }
 0x172   : > { %751 = vmatpush1.bf16.msra.mxu0 %v1648_v34  ;;  %792 = vmatpush1.bf16.msra.mxu1 %v1650_v35 }
 0x173   : > { %910 = vmatprep.subr.bf16.mxu0 %v1556_v2  ;;  %951 = vmatprep.subr.bf16.mxu1 %v1558_v3 }
 0x228   : > { %v596_v53 = vpop.f32.mrb[4].mxu0  ;;  %v637_v54 = vpop.f32.mrb[4].mxu1 }
 0x229   : > { %v598_v55 = vpop.f32.mrb[5].mxu0  ;;  %v639_v56 = vpop.f32.mrb[5].mxu1 }
 0x22a   : > { %v648_v57 = vcombine.low %v596_v53, %v598_v55  ;;  %v649_v58 = vcombine.low %v637_v54, %v639_v56  ;;  %v600_v59 = vpop.f32.mrb[6].mxu0  ;;  %v641_v60 = vpop.f32.mrb[6].mxu1 }
 0x22b   : > { %v601_v61 = vpop.f32.mrb[7].mxu0  ;;  %v642_v62 = vpop.f32.mrb[7].mxu1 }
 0x22c   : > { %v656_v63 = vrot.slane %v648_v57, %v1690_v44  ;;  %v663_v1 = vrot.slane %v649_v58, %v1690_v44 }
 0x22e   : > { %v664_v33 = vcombine.low %v656_v63, %v663_v1 }
 0x230   : > { %v666_v2 = vadd.f32 %v664_v33, %v528_v0 }
 0x232   : > { %v1245_v36 = vmul.f32 -1.442695, %v666_v2  ;;  %v674_v3 = vrot.slane %v666_v2, 2  ;;  %v685_v38 = vrot.slane %v666_v2, 6  ;;  %v682_v41 = vrot.slane %v666_v2, 4 }
 0x234   : > { %1332 = vpow2.f32 %v1245_v36  ;;  %v1246_v37 = vmul.f32 -1.442695, %v674_v3  ;;  %v1247_v39 = vmul.f32 -1.442695, %v685_v38 }
 0x236   : > { %1334 = vpow2.f32 %v1246_v37 }
 0x237   : > { %1336 = vpow2.f32 %v1247_v39 }
 0x23e   : > { %v1333_v40 = vpop.eup %1332 }
 0x23f   : > { %v670_v42 = vadd.f32 1.0, %v1333_v40 }
 0x240   : > { %v1335_v43 = vpop.eup %1334 }
 0x241   : > { %1338 = vrcp.f32 %v670_v42  ;;  %v679_v45 = vadd.f32 1.0, %v1335_v43  ;;  %v1337_v46 = vpop.eup %1336 }
 0x242   : > { %1340 = vtanh.f32 %v682_v41  ;;  %v690_v51 = vadd.f32 1.0, %v1337_v46 }
 0x243   : > { %1342 = vrcp.f32 %v679_v45 }
 0x244   : > { %1344 = vrcp.f32 %v690_v51 }
 0x24b   : > { %v1339_v47 = vpop.eup %1338 }
 0x24c   : > { %v1341_v49 = vpop.eup %1340 }
 0x24d   : > { %v1343_v50 = vpop.eup %1342  ;;  %v694_v53 = vmul.f32 %v1341_v49, %v1339_v47 }
 0x24e   : > { %v693_v52 = vmul.f32 %v1343_v50, %v1698_v48  ;;  %v1345_v55 = vpop.eup %1344 }
 0x250   : > { %v1740_v54 = vadd.f32 %v694_v53, %v693_v52 }
 0x252   : > { %1346 = vtanh.f32 %v1740_v54 }
 0x25c   : > { %v1347_v56 = vpop.eup %1346 }
 0x25d   : > { %v697_v57 = vmul.f32 %v1347_v56, %v1345_v55 }
 0x25f   : > { %1248 = vst [vmem:[%s1544_s10 + $0x2] sm:$0x3] %v697_v57  ;;  %v703_v58 = vpack.c.bf16 %v697_v57, %v697_v57 }
 0x261   : > { %769 = vmatmul.mubr.bf16.vlgmr.msra.gmra.mrb[8].mxu0 %v703_v58  ;;  %810 = vmatmul.mubr.bf16.vlgmr.msra.gmra.mrb[8].mxu1 %v703_v58 }
 0x262   : > { %911 = vmatpush1.bf16.msra.mxu0 %v1560_v4  ;;  %952 = vmatpush1.bf16.msra.mxu1 %v1564_v5 }
 0x263   : > { %912 = vmatprep.subr.bf16.mxu0 %v1566_v6  ;;  %953 = vmatprep.subr.bf16.mxu1 %v1568_v7  ;;  %v1249_v7 = vld [vmem:[%s1539_s7 + $0x8] sm:$0xff]  }
 0x264   : > { %942 = vmatprep.mubr.bf16.mxu0 %v1475_v12  ;;  %983 = vmatprep.mubr.bf16.mxu1 %v1475_v12  ;;  %v876_v43 = vunpack.c.h.bf16 %v1249_v7 }
 0x266   : > { %913 = vmatpush1.bf16.msra.mxu0 %v1574_v8  ;;  %954 = vmatpush1.bf16.msra.mxu1 %v1576_v9 }
 0x267   : > { %914 = vmatprep.subr.bf16.mxu0 %v1578_v10  ;;  %955 = vmatprep.subr.bf16.mxu1 %v1580_v11 }
 0x26a   : > { %915 = vmatpush1.bf16.msra.mxu0 %v1588_v13  ;;  %956 = vmatpush1.bf16.msra.mxu1 %v1590_v14 }
 0x26b   : > { %916 = vmatprep.subr.bf16.mxu0 %v1592_v15  ;;  %957 = vmatprep.subr.bf16.mxu1 %v1594_v16  ;;  %v702_v16 = vunpack.c.l.bf16 %v1249_v7 }
 0x26e   : > { %917 = vmatpush1.bf16.msra.mxu0 %v1600_v17  ;;  %958 = vmatpush1.bf16.msra.mxu1 %v1602_v18 }
 0x26f   : > { %918 = vmatprep.subr.bf16.mxu0 %v1604_v19  ;;  %959 = vmatprep.subr.bf16.mxu1 %v1606_v20 }
 0x272   : > { %919 = vmatpush1.bf16.msra.mxu0 %v1612_v21  ;;  %960 = vmatpush1.bf16.msra.mxu1 %v1614_v22 }
 0x273   : > { %920 = vmatprep.subr.bf16.mxu0 %v1616_v23  ;;  %961 = vmatprep.subr.bf16.mxu1 %v1618_v24 }
 0x276   : > { %921 = vmatpush1.bf16.msra.mxu0 %v1624_v25  ;;  %962 = vmatpush1.bf16.msra.mxu1 %v1626_v26 }
 0x277   : > { %922 = vmatprep.subr.bf16.mxu0 %v1628_v27  ;;  %963 = vmatprep.subr.bf16.mxu1 %v1630_v28 }
 0x27a   : > { %923 = vmatpush1.bf16.msra.mxu0 %v1636_v29  ;;  %964 = vmatpush1.bf16.msra.mxu1 %v1638_v30 }
 0x27b   : > { %924 = vmatprep.subr.bf16.mxu0 %v1640_v31  ;;  %965 = vmatprep.subr.bf16.mxu1 %v1642_v32 }
 0x27e   : > { %925 = vmatpush1.bf16.msra.mxu0 %v1648_v34  ;;  %966 = vmatpush1.bf16.msra.mxu1 %v1650_v35 }
 0x334   : > { %v770_v4 = vpop.f32.mrb[8].mxu0  ;;  %v811_v5 = vpop.f32.mrb[8].mxu1 }
 0x335   : > { %v772_v6 = vpop.f32.mrb[9].mxu0  ;;  %v813_v8 = vpop.f32.mrb[9].mxu1 }
 0x336   : > { %v822_v9 = vcombine.low %v770_v4, %v772_v6  ;;  %v823_v10 = vcombine.low %v811_v5, %v813_v8  ;;  %v774_v11 = vpop.f32.mrb[10].mxu0  ;;  %v815_v12 = vpop.f32.mrb[10].mxu1 }
 0x337   : > { %v775_v13 = vpop.f32.mrb[11].mxu0  ;;  %v816_v14 = vpop.f32.mrb[11].mxu1 }
 0x338   : > { %v830_v15 = vrot.slane %v822_v9, %v1690_v44  ;;  %v837_v17 = vrot.slane %v823_v10, %v1690_v44 }
 0x33a   : > { %v838_v18 = vcombine.low %v830_v15, %v837_v17 }
 0x33c   : > { %v840_v19 = vadd.f32 %v838_v18, %v702_v16 }
 0x33e   : > { %v1250_v20 = vmul.f32 -1.442695, %v840_v19  ;;  %v848_v21 = vrot.slane %v840_v19, 2  ;;  %v859_v23 = vrot.slane %v840_v19, 6  ;;  %v856_v26 = vrot.slane %v840_v19, 4 }
 0x340   : > { %1348 = vpow2.f32 %v1250_v20  ;;  %v1251_v22 = vmul.f32 -1.442695, %v848_v21  ;;  %v1252_v24 = vmul.f32 -1.442695, %v859_v23 }
 0x342   : > { %1350 = vpow2.f32 %v1251_v22 }
 0x343   : > { %1352 = vpow2.f32 %v1252_v24 }
 0x34a   : > { %v1349_v25 = vpop.eup %1348 }
 0x34b   : > { %v844_v27 = vadd.f32 1.0, %v1349_v25 }
 0x34c   : > { %v1351_v28 = vpop.eup %1350 }
 0x34d   : > { %1354 = vrcp.f32 %v844_v27  ;;  %v853_v29 = vadd.f32 1.0, %v1351_v28  ;;  %v1353_v30 = vpop.eup %1352 }
 0x34e   : > { %1356 = vtanh.f32 %v856_v26  ;;  %v864_v35 = vadd.f32 1.0, %v1353_v30 }
 0x34f   : > { %1358 = vrcp.f32 %v853_v29 }
 0x350   : > { %1360 = vrcp.f32 %v864_v35 }
 0x357   : > { %v1355_v31 = vpop.eup %1354 }
 0x358   : > { %v1357_v32 = vpop.eup %1356 }
 0x359   : > { %v1359_v34 = vpop.eup %1358  ;;  %v868_v59 = vmul.f32 %v1357_v32, %v1355_v31 }
 0x35a   : > { %v867_v48 = vmul.f32 %v1359_v34, %v1740_v54  ;;  %v1361_v61 = vpop.eup %1360 }
 0x35c   : > { %v869_v60 = vadd.f32 %v868_v59, %v867_v48 }
 0x35e   : > { %1362 = vtanh.f32 %v869_v60 }
 0x368   : > { %v1363_v62 = vpop.eup %1362 }
 0x369   : > { %v871_v63 = vmul.f32 %v1363_v62, %v1361_v61 }
 0x36b   : > { %1253 = vst [vmem:[%s1544_s10 + $0x4] sm:$0x3] %v871_v63  ;;  %v877_v0 = vpack.c.bf16 %v871_v63, %v871_v63 }
 0x36d   : > { %943 = vmatmul.mubr.bf16.vlgmr.msra.gmra.mrb[12].mxu0 %v877_v0  ;;  %984 = vmatmul.mubr.bf16.vlgmr.msra.gmra.mrb[12].mxu1 %v877_v0 }
 0x440   : > { %v944_v1 = vpop.f32.mrb[12].mxu0  ;;  %v985_v33 = vpop.f32.mrb[12].mxu1 }
 0x441   : > { %v946_v2 = vpop.f32.mrb[13].mxu0  ;;  %v987_v36 = vpop.f32.mrb[13].mxu1 }
 0x442   : > { %v996_v3 = vcombine.low %v944_v1, %v946_v2  ;;  %v997_v37 = vcombine.low %v985_v33, %v987_v36  ;;  %v948_v38 = vpop.f32.mrb[14].mxu0  ;;  %v989_v39 = vpop.f32.mrb[14].mxu1 }
 0x443   : > { %v949_v40 = vpop.f32.mrb[15].mxu0  ;;  %v990_v41 = vpop.f32.mrb[15].mxu1 }
 0x444   : > { %v1004_v42 = vrot.slane %v996_v3, %v1690_v44  ;;  %v1011_v45 = vrot.slane %v997_v37, %v1690_v44 }
 0x446   : > { %v1012_v46 = vcombine.low %v1004_v42, %v1011_v45 }
 0x448   : > { %v1014_v47 = vadd.f32 %v1012_v46, %v876_v43 }
 0x44a   : > { %v1255_v49 = vmul.f32 -1.442695, %v1014_v47  ;;  %v1022_v50 = vrot.slane %v1014_v47, 2  ;;  %v1033_v52 = vrot.slane %v1014_v47, 6  ;;  %v1030_v55 = vrot.slane %v1014_v47, 4 }
 0x44c   : > { %1364 = vpow2.f32 %v1255_v49  ;;  %v1256_v51 = vmul.f32 -1.442695, %v1022_v50  ;;  %v1257_v53 = vmul.f32 -1.442695, %v1033_v52 }
 0x44e   : > { %1366 = vpow2.f32 %v1256_v51 }
 0x44f   : > { %1368 = vpow2.f32 %v1257_v53 }
 0x456   : > { %v1365_v54 = vpop.eup %1364 }
 0x457   : > { %v1018_v56 = vadd.f32 1.0, %v1365_v54 }
 0x458   : > { %v1367_v57 = vpop.eup %1366 }
 0x459   : > { %1370 = vrcp.f32 %v1018_v56  ;;  %v1027_v58 = vadd.f32 1.0, %v1367_v57  ;;  %v1369_v44 = vpop.eup %1368 }
 0x45a   : > { %1372 = vtanh.f32 %v1030_v55  ;;  %v1038_v7 = vadd.f32 1.0, %v1369_v44 }
 0x45b   : > { %1374 = vrcp.f32 %v1027_v58 }
 0x45c   : > { %1376 = vrcp.f32 %v1038_v7 }
 0x463   : > { %v1371_v4 = vpop.eup %1370 }
 0x464   : > { %v1373_v5 = vpop.eup %1372 }
 0x465   : > { %v1375_v6 = vpop.eup %1374  ;;  %v1042_v9 = vmul.f32 %v1373_v5, %v1371_v4 }
 0x466   : > { %v1041_v8 = vmul.f32 %v1375_v6, %v869_v60  ;;  %v1377_v11 = vpop.eup %1376 }
 0x468   : > { %v1043_v10 = vadd.f32 %v1042_v9, %v1041_v8 }
 0x46a   : > { %1378 = vtanh.f32 %v1043_v10  ;;  %1049 = vst [vmem:[#allocation4] sm:$0x3] %v1043_v10  ;;  %1055 = vst [vmem:[#allocation8] sm:$0x3] (!%p1259_p6), %v1043_v10 }
 0x471   : > { %1053 = sbr.rel (%p1259_p6) target bundleno = 1145 (0x479), region = 40 }
 0x474   : > { %v1379_v12 = vpop.eup %1378 }
 0x475   : > { %v1045_v13 = vmul.f32 %v1379_v12, %v1377_v11 }
 0x477   : > { %1258 = vst [vmem:[%s1544_s10 + $0x6] sm:$0x3] %v1045_v13  ;;  %1048 = vst [vmem:[#allocation3] sm:$0x3] %v1045_v13 }
 0x478   : > { %1054 = vst [vmem:[#allocation6] sm:$0x3] %v1045_v13 }
 0x479 PF: > { %p1787_p7 = scmp.eq.s32.totalorder %s1227_s24, 1  ;;  %s1477_s13 = smov [#allocation6]  }
 0x47a   : > { %s1077_s14 = sshll.u32 %s1477_s13, 4  ;;  %s1478_s15 = smov [#allocation8]   ;;  %s1078_s14 = int_to_ptr.vmem [resolvable:$true] %s1077_s14 }
 0x47b   : > { %s1090_s16 = sshll.u32 %s1478_s15, 4  ;;  %s1380_s10 = scalar_lea.vmem %s1078_s14, 32  ;;  %s1791_s16 = int_to_ptr.vmem [resolvable:$true] %s1090_s16 }
 0x47c   : > { %p1381_p8 = scmp.ne.s32.totalorder %s1078_s14, %s1380_s10  ;;  %p1387_p11 = scmp.lt.s32.totalorder %s1078_s14, %s1078_s14 }
 0x47d   : > { %p1388_p12 = scmp.lt.s32.totalorder %s1380_s10, %s1380_s10 }
 0x47e   : > { %p1382_p9 = pnand %p1381_p8, %p1787_p7 }
 0x47f   : > { %p1389_p13 = por %p1388_p12, %p1387_p11 }
 0x480   : > { %p1383_p10 = pneg %p1382_p9 }
 0x482   : > { %p1390_p0 = pnand %p1389_p13, %p1383_p10 }
 0x484   : > { %1393 = shalt.err (!%p1390_p0)
}
 0x485   : > { %s1394_s17 = scalar_lea.hbm %s1856_s5, 32 }
 0x486   : > { %p1395_p1 = scmp.ne.s32.totalorder %s1856_s5, %s1394_s17  ;;  %p1400_p4 = scmp.lt.u32.totalorder %s1394_s17, %s1856_s5 }
 0x488   : > { %p1396_p2 = pnand %p1395_p1, %p1787_p7 }
 0x48a   : > { %p1397_p3 = pneg %p1396_p2 }
 0x48c   : > { %p1402_p5 = pnand %p1400_p4, %p1397_p3 }
 0x48e   : > { %1405 = shalt.err (!%p1402_p5)
}
 0x48f   : > { %1268 = dma.vmem_to_hbm [thread:$0]  (%p1787_p7), %s1078_s14, 32, %s1856_s5, [#allocation7]  }
 0x490   : > { %s1406_s29 = scalar_lea.vmem %s1791_s16, 32  ;;  %p1413_p10 = scmp.lt.s32.totalorder %s1791_s16, %s1791_s16 }
 0x491   : > { %p1407_p6 = scmp.ne.s32.totalorder %s1791_s16, %s1406_s29  ;;  %p1414_p11 = scmp.lt.s32.totalorder %s1406_s29, %s1406_s29 }
 0x493   : > { %p1408_p8 = pnand %p1407_p6, %p1787_p7  ;;  %p1415_p12 = por %p1414_p11, %p1413_p10 }
 0x495   : > { %p1409_p9 = pneg %p1408_p8 }
 0x497   : > { %p1416_p13 = pnand %p1415_p12, %p1409_p9 }
 0x499   : > { %1419 = shalt.err (!%p1416_p13)
}
 0x49a   : > { %s1420_s9 = scalar_lea.hbm %s1857_s6, 32 }
 0x49b   : > { %p1421_p0 = scmp.ne.s32.totalorder %s1857_s6, %s1420_s9  ;;  %p1426_p3 = scmp.lt.u32.totalorder %s1420_s9, %s1857_s6 }
 0x49d   : > { %p1422_p1 = pnand %p1421_p0, %p1787_p7 }
 0x49f   : > { %p1423_p2 = pneg %p1422_p1 }
 0x4a1   : > { %p1428_p4 = pnand %p1426_p3, %p1423_p2 }
 0x4a3   : > { %1431 = shalt.err (!%p1428_p4)
}
 0x4a4   : > { %1270 = dma.vmem_to_hbm [thread:$0]  (%p1787_p7), %s1791_s16, 32, %s1857_s6, [#allocation9]  }
 0x4a5   : > { %1447 = dma.done.wait (%p1787_p7), [#allocation7], 32  }
 0x4a6   : > { %1449 = vsyncadd (%p1787_p7), [#allocation7], 4294967264 }
 0x4a7   : > { %1451 = dma.done.wait (%p1787_p7), [#allocation9], 32  }
 0x4a8   : > { %1453 = vsyncadd (%p1787_p7), [#allocation9], 4294967264 }
 0x4a9 PF: > { %s19_s23 = sadd.s32 1, %s1464_s23   ;;  %s1859_s21 = smov %s1460_s22 }
 0x4aa   : > { %p16_p5 = scmp.ge.s32.totalorder %s19_s23, 4   ;;  %s1860_s22 = smov %s1862_s25 }
 0x4ac   :  { %18 = sbr.rel (!%p16_p5) target bundleno = 3 (0x3), region = 109 }
 0x4b3   :  { %1118 = vsyncpa [#allocation7], 1 }
 0x4b4   :  { %1120 = vsyncpa [#allocation7 + $0x1], 1 }
 0x4b5   :  { %1121 = vsyncpa [#allocation9], 1 }
 0x4b6   :  { %1122 = vsyncmov [#allocation5] }
 0x4b9   :  { %s1123_s16 = vpop.sfrf %1122 }
 0x4ba   :  { %p1266_p6 = scmp.ne.s32.totalorder %s1123_s16, 0 }
 0x4bc   :  { %1127 = shalt.err (%p1266_p6)  }

</bundles_post_ra>
